<compile_context>
chip_gen: v5e
topology: v5e:2x2
jax: 0.10.0
libtpu: 0.0.40
codegen_flags: <defaults>
</compile_context>

<pallas_src>
import jax
import jax.numpy as jnp
from jax.experimental import pallas as pl
from jax.experimental.pallas import tpu as pltpu


def _dma_copy_kernel(x_ref, o_ref, sem):
    # Single HBM->HBM DMA of the whole buffer: no VMEM staging, no block-shape
    # constraints, no per-grid-step overhead, exact byte count for any size.
    cp = pltpu.make_async_copy(x_ref, o_ref, sem)
    cp.start()
    cp.wait()


def _pallas_dma_copy(x):
    """Materialize a bit-exact copy of `x` via one direct HBM->HBM DMA."""
    if x.size == 0:
        return x
    nbytes = x.size * jnp.dtype(x.dtype).itemsize
    return pl.pallas_call(
        _dma_copy_kernel,
        out_shape=jax.ShapeDtypeStruct(x.shape, x.dtype),
        in_specs=[pl.BlockSpec(memory_space=pl.ANY)],   # raw HBM ref, no auto-DMA
        out_specs=pl.BlockSpec(memory_space=pl.ANY),    # raw HBM ref, no auto-DMA
        scratch_shapes=[pltpu.SemaphoreType.DMA(())],
        cost_estimate=pl.CostEstimate(
            flops=0, transcendentals=0, bytes_accessed=2 * nbytes
        ),
    )(x)


def _flatten_shape(shape, ndim, start_dim, end_dim):
    """torch.flatten output shape (handles negative dims and 0-d input)."""
    if ndim == 0:
        return (1,)  # torch.flatten of a 0-d tensor -> 1-element 1-D tensor
    sd = start_dim % ndim
    ed = end_dim % ndim
    assert sd <= ed, "start_dim must be <= end_dim"
    collapsed = 1
    for d in shape[sd:ed + 1]:
        collapsed *= d
    return shape[:sd] + (collapsed,) + shape[ed + 1:]


def flatten_forward(x, start_dim=0, end_dim=-1, use_pallas_copy=False):
    """Reproduces torch.flatten(x, start_dim, end_dim).

    Default path is zero-copy (metadata-only reshape).  Set use_pallas_copy=True to
    force a materialized copy via a single Pallas HBM->HBM DMA.
    """
    out_shape = _flatten_shape(x.shape, x.ndim, start_dim, end_dim)
    y = jnp.reshape(x, out_shape)            # metadata-only on contiguous data
    if not use_pallas_copy:
        return y                             # fastest possible: zero HBM traffic
    return _pallas_dma_copy(y)               # explicit copy: one HBM->HBM DMA


class Flatten:
    """Mirror of the PyTorch module (no parameters)."""

    def __init__(self, start_dim=0, end_dim=-1, use_pallas_copy=False):
        self.start_dim = start_dim
        self.end_dim = end_dim
        self.use_pallas_copy = use_pallas_copy

    def __call__(self, x):
        return flatten_forward(x, self.start_dim, self.end_dim,
                               use_pallas_copy=self.use_pallas_copy)


if __name__ == "__main__":
    key = jax.random.PRNGKey(0)
    # layout: NCHW
    x = jax.random.normal(key, (2, 4, 16, 16), dtype=jnp.float32)

    # default module configuration: zero-copy metadata-only flatten
    mod_full = Flatten()
    y_full = jax.block_until_ready(mod_full(x))
    assert y_full.shape == (2 * 4 * 16 * 16,)
    assert jnp.array_equal(y_full, jnp.reshape(x, (-1,)))

    # Pallas HBM->HBM DMA copy path: Flatten(start_dim=1) -> (N, C*H*W)
    mod_feat = Flatten(start_dim=1, use_pallas_copy=True)
    y_feat = jax.block_until_ready(mod_feat(x))
    assert y_feat.shape == (2, 4 * 16 * 16)
    assert jnp.array_equal(y_feat, jnp.reshape(x, (2, -1)))

    # bf16 input through the DMA copy path (byte-exact, dtype-agnostic)
    xb = x.astype(jnp.bfloat16)
    yb = jax.block_until_ready(Flatten(start_dim=1, use_pallas_copy=True)(xb))
    assert jnp.array_equal(yb, jnp.reshape(xb, (2, -1)))

    # non-128-multiple total (420 elems): single DMA, no bulk/tail stitch
    x_odd = jax.random.normal(jax.random.PRNGKey(1), (2, 3, 70), dtype=jnp.float32)
    y_odd = jax.block_until_ready(Flatten(start_dim=1, use_pallas_copy=True)(x_odd))
    assert jnp.array_equal(y_odd, jnp.reshape(x_odd, (2, -1)))

    # tiny total (< 128 elems): same single-DMA path
    x_tiny = jax.random.normal(jax.random.PRNGKey(2), (3, 5, 7), dtype=jnp.float32)
    y_tiny = jax.block_until_ready(Flatten(use_pallas_copy=True)(x_tiny))
    assert jnp.array_equal(y_tiny, jnp.reshape(x_tiny, (-1,)))

    # 0-d input: torch.flatten -> shape (1,) (zero-copy path)
    y_scalar = jax.block_until_ready(Flatten()(jnp.asarray(3.0)))
    assert y_scalar.shape == (1,) and y_scalar[0] == 3.0

    print("KERNEL_OK")
</pallas_src>

<mosaic_0001>
module attributes {stable_mosaic.version = 11 : i64} {
  func.func @_dma_copy_kernel(%arg0: memref<2x1024xf32, #tpu.memory_space<any>>, %arg1: memref<2x1024xf32, #tpu.memory_space<any>>, %arg2: memref<!tpu.dma_semaphore, #tpu.memory_space<semaphore_mem>>) attributes {dimension_semantics = [], scalar_prefetch = 0 : i64, scratch_operands = 1 : i64, tpu.core_type = #tpu.core_type<tc>} {
    tpu.enqueue_dma source(%arg0 : memref<2x1024xf32, #tpu.memory_space<any>>) target(%arg1 : memref<2x1024xf32, #tpu.memory_space<any>>) target_semaphore(%arg2 : memref<!tpu.dma_semaphore, #tpu.memory_space<semaphore_mem>>)
    tpu.wait_dma2 semaphore(%arg2 : memref<!tpu.dma_semaphore, #tpu.memory_space<semaphore_mem>>) src(%arg0 : memref<2x1024xf32, #tpu.memory_space<any>>) dst(%arg1 : memref<2x1024xf32, #tpu.memory_space<any>>)
    return
  }
}

</mosaic_0001>

<bundles_post_ra>
// kernel: tpu_custom_call.1
= control target key start
LH: loop header
LB: loop body
LE: loop exit
PB: predicated region body
PF: predicated region fallthrough
CT: control target
= control target key end

     0   :  { %s33_s12 = smov [#allocation2]   ;;  %s34_s13 = smov [#allocation3]   ;;  %s52_s0 = inlined_call_operand.hbm [shape: f32[2,1024], index: 0, kind: input, shape index: {}]   ;;  %s53_s1 = inlined_call_operand.hbm [shape: f32[2,1024], index: 1, kind: output, shape index: {}]  }
   0x1   :  { %s10_s8 = sshll.u32 %s52_s0, 4  ;;  %s12_s11 = sshll.u32 %s53_s1, 4  ;;  %s11_s8 = int_to_ptr.hbm [resolvable:$true] %s10_s8  ;;  %s13_s11 = int_to_ptr.hbm [resolvable:$true] %s12_s11 }
   0x2   :  { %s35_s14 = smov 0  }
   0x3   :  { %16 = dma.general %s11_s8, 256, %s13_s11, %s33_s12, %s34_s13, [#allocation4], %s35_s14, 0  }
   0x4   :  { %31 = dma.done.wait [#allocation2], 256 }
   0x5   :  { %32 = vsyncadd [#allocation2], 4294967040 }
   0x6   :  { %21 = vsyncmov [#allocation2] }
   0x9   :  { %s22_s15 = vpop.sfrf %21 }
   0xa   :  { %p27_p0 = scmp.ne.s32.totalorder %s22_s15, 0 }
   0xc   :  { %26 = shalt.err (%p27_p0)  }

</bundles_post_ra>
